<compile_context>
chip_gen: v5e
topology: v5e:2x2
jax: 0.10.0
libtpu: 0.0.40
codegen_flags: <defaults>
</compile_context>

<pallas_src>
import jax
import jax.numpy as jnp
from jax.experimental import pallas as pl
from jax.experimental.pallas import tpu as pltpu


INPUT_DIM = 32
HIDDEN_DIM = 64
OUTPUT_DIM = 24


def telm_kernel(x_ref, w1t_ref, b1_ref, w3t_ref, o_ref):
    # fc1: (tb, IN) @ (IN, HID) -> (tb, HID), f32 accumulation on the MXU.
    h = jnp.dot(x_ref[...], w1t_ref[...], preferred_element_type=jnp.float32)
    # Bias as a (1, HID) row: plain VPU add with sublane broadcast.
    h = h + b1_ref[...]
    # DSIG(t) = (1 - exp(-t)) / (1 + exp(-t)) == tanh(t/2): one EUP op, no overflow.
    a = jnp.tanh(0.5 * h)
    # fc3 (no bias): (tb, HID) @ (HID, OUT) -> (tb, OUT), f32 accumulation.
    out = jnp.dot(a.astype(w3t_ref.dtype), w3t_ref[...],
                  preferred_element_type=jnp.float32)
    o_ref[...] = out.astype(o_ref.dtype)


def _round_up(n, m):
    return ((n + m - 1) // m) * m


def telm_forward(x, w1, b1, w3, *, block_b=16384):
    """TELM forward: out = fc3(DSIG(fc1(x))).

    x : (B, INPUT_DIM)            -- streamed in natural layout, dtype preserved
    w1: (HIDDEN_DIM, INPUT_DIM)   -- PyTorch nn.Linear layout
    b1: (HIDDEN_DIM,)
    w3: (OUTPUT_DIM, HIDDEN_DIM)  -- PyTorch nn.Linear layout

    Returns (B, OUTPUT_DIM) in x.dtype.
    For the bf16 path, pass bf16 `x` (no hidden wrapper cast; f32 accumulation).
    """
    assert block_b % 8 == 0, "batch tile must be a multiple of 8 sublanes"
    B = x.shape[0]
    dt = x.dtype

    # One-time, KB-scale weight transposes so the kernel runs plain NN matmuls.
    w1t = jnp.asarray(w1, dt).T                                  # (IN, HID)
    w3t = jnp.asarray(w3, dt).T                                  # (HID, OUT)
    b1r = jnp.asarray(b1, jnp.float32).reshape(1, HIDDEN_DIM)    # (1, HID)

    # Batch tile selection:
    #   * big tiles amortize the ~0.35 us/step grid overhead,
    #   * >=2 steps once B >= 4096 so DMA/compute overlap (and a v7x core split)
    #     has something to work with,
    #   * tiny batches use a single full-extent block (always a legal BlockSpec).
    if B <= block_b:
        tb = _round_up(pl.cdiv(B, 2), 8) if B >= 4096 else B
    else:
        tb = block_b
    grid = (pl.cdiv(B, tb),)   # trailing partial block is masked by Pallas; no jnp.pad

    # VMEM budget: double-buffered x/out streams + f32 intermediates (h, a, out).
    # Keep <= 64 MiB so the limit is valid on v7x; >= 32 MiB to lift the
    # v5e (16 MiB) / v6e (32 MiB) scoped defaults.
    itemsize = jnp.dtype(dt).itemsize
    per_step = tb * (2 * INPUT_DIM * itemsize + 2 * OUTPUT_DIM * itemsize
                     + 3 * HIDDEN_DIM * 4)
    vmem_limit = int(min(64 * 2**20, max(32 * 2**20, 2 * per_step)))

    grid_spec = pl.GridSpec(
        grid=grid,
        in_specs=[
            pl.BlockSpec((tb, INPUT_DIM), lambda i: (i, 0)),            # streamed x tile
            pl.BlockSpec((INPUT_DIM, HIDDEN_DIM), lambda i: (0, 0)),    # resident w1^T
            pl.BlockSpec((1, HIDDEN_DIM), lambda i: (0, 0)),            # resident bias row
            pl.BlockSpec((HIDDEN_DIM, OUTPUT_DIM), lambda i: (0, 0)),   # resident w3^T
        ],
        out_specs=pl.BlockSpec((tb, OUTPUT_DIM), lambda i: (i, 0)),     # natural (B, 24)
    )

    return pl.pallas_call(
        telm_kernel,
        out_shape=jax.ShapeDtypeStruct((B, OUTPUT_DIM), dt),
        grid_spec=grid_spec,
        compiler_params=pltpu.CompilerParams(
            dimension_semantics=("parallel",),      # batch steps are independent
            vmem_limit_bytes=vmem_limit,
        ),
    )(x, w1t, b1r, w3t)


def _reference(x, w1, b1, w3):
    xf = x.astype(jnp.float32)
    h = xf @ w1.T + b1
    a = jnp.tanh(0.5 * h)   # == (1 - exp(-h)) / (1 + exp(-h)), without the NaN for h << 0
    return a @ w3.T


if __name__ == "__main__":
    key = jax.random.PRNGKey(0)
    k_x, k_w1, k_b1, k_w3, k_x2, k_x3 = jax.random.split(key, 6)

    # Deterministic PyTorch-style parameter init.
    bound1 = 1.0 / (INPUT_DIM ** 0.5)
    w1 = jax.random.uniform(k_w1, (HIDDEN_DIM, INPUT_DIM),
                            minval=-bound1, maxval=bound1, dtype=jnp.float32)
    b1 = jax.random.uniform(k_b1, (HIDDEN_DIM,),
                            minval=-bound1, maxval=bound1, dtype=jnp.float32)
    bound3 = 1.0 / (HIDDEN_DIM ** 0.5)
    w3 = jax.random.uniform(k_w3, (OUTPUT_DIM, HIDDEN_DIM),
                            minval=-bound3, maxval=bound3, dtype=jnp.float32)

    # Small-batch case (single full-extent block).
    B = 8
    x = jax.random.normal(k_x, (B, INPUT_DIM), dtype=jnp.float32)
    out = jax.block_until_ready(telm_forward(x, w1, b1, w3))
    ref = _reference(x, w1, b1, w3)
    assert out.shape == (B, OUTPUT_DIM)
    assert jnp.allclose(out, ref, atol=1e-5, rtol=1e-5), "f32 small-batch mismatch"

    # Tiled batch with a partial trailing block (exercises uneven-grid masking,
    # natural-layout streaming, and grid pipelining).  No pad, no transposes.
    B2 = 300
    x2 = jax.random.normal(k_x2, (B2, INPUT_DIM), dtype=jnp.float32)
    out2 = jax.block_until_ready(telm_forward(x2, w1, b1, w3, block_b=128))
    ref2 = _reference(x2, w1, b1, w3)
    assert out2.shape == (B2, OUTPUT_DIM)
    assert jnp.allclose(out2, ref2, atol=1e-5, rtol=1e-5), "tiled-batch mismatch"

    # Larger batch below block_b: forces >=2 grid steps (overlap / megacore path).
    B3 = 4500
    x3 = jax.random.normal(k_x3, (B3, INPUT_DIM), dtype=jnp.float32)
    out3 = jax.block_until_ready(telm_forward(x3, w1, b1, w3))
    ref3 = _reference(x3, w1, b1, w3)
    assert out3.shape == (B3, OUTPUT_DIM)
    assert jnp.allclose(out3, ref3, atol=1e-4, rtol=1e-4), "split-batch mismatch"

    # bf16 path: caller supplies bf16 x; no hidden wrapper cast, f32 accumulation.
    out_bf16 = jax.block_until_ready(
        telm_forward(x2.astype(jnp.bfloat16), w1, b1, w3, block_b=128))
    assert out_bf16.dtype == jnp.bfloat16
    assert jnp.allclose(out_bf16.astype(jnp.float32), ref2, atol=1e-1, rtol=1e-1), \
        "bf16 path mismatch"

    # TODO(synk): TELM.fit uses torch.pinverse (SVD-based pseudo-inverse) and the
    # unused fc2 branch; not part of forward(), no clean Pallas equivalent, omitted.
    print("KERNEL_OK")
</pallas_src>

<mosaic_0001>
module attributes {stable_mosaic.version = 11 : i64} {
  func.func @telm_kernel(%arg0: i32, %arg1: memref<8x32xf32, #tpu.memory_space<vmem>>, %arg2: memref<32x64xf32, #tpu.memory_space<vmem>>, %arg3: memref<1x64xf32, #tpu.memory_space<vmem>>, %arg4: memref<64x24xf32, #tpu.memory_space<vmem>>, %arg5: memref<8x24xf32, #tpu.memory_space<vmem>>) attributes {dimension_semantics = [#tpu.dimension_semantics<parallel>], iteration_bounds = array<i64: 1>, scalar_prefetch = 0 : i64, scratch_operands = 0 : i64, tpu.core_type = #tpu.core_type<tc>, window_params = [{transform_indices = @transform_0, window_bounds = array<i64: 8, 32>}, {pipeline_mode = #tpu.pipeline_mode<synchronous>, transform_indices = @transform_1, window_bounds = array<i64: 32, 64>}, {pipeline_mode = #tpu.pipeline_mode<synchronous>, transform_indices = @transform_2, window_bounds = array<i64: 1, 64>}, {pipeline_mode = #tpu.pipeline_mode<synchronous>, transform_indices = @transform_3, window_bounds = array<i64: 64, 24>}, {transform_indices = @transform_4, window_bounds = array<i64: 8, 24>}]} {
    %c0 = arith.constant 0 : index
    %c0_0 = arith.constant 0 : index
    %0 = vector.load %arg1[%c0, %c0_0] : memref<8x32xf32, #tpu.memory_space<vmem>>, vector<8x32xf32>
    %c0_1 = arith.constant 0 : index
    %c0_2 = arith.constant 0 : index
    %1 = vector.load %arg2[%c0_1, %c0_2] : memref<32x64xf32, #tpu.memory_space<vmem>>, vector<32x64xf32>
    %cst = arith.constant dense<0.000000e+00> : vector<8x64xf32>
    %2 = tpu.matmul %0, %1, %cst {dimension_numbers = #tpu.dot_dimension_numbers<[1], [0], [0], [1], [0, 0, 1, 1], [], []>} : vector<8x32xf32>, vector<32x64xf32>, vector<8x64xf32> -> vector<8x64xf32>
    %c0_3 = arith.constant 0 : index
    %c0_4 = arith.constant 0 : index
    %3 = vector.load %arg3[%c0_3, %c0_4] : memref<1x64xf32, #tpu.memory_space<vmem>>, vector<1x64xf32>
    %4 = vector.broadcast %3 : vector<1x64xf32> to vector<8x64xf32>
    %5 = arith.addf %2, %4 : vector<8x64xf32>
    %cst_5 = arith.constant 5.000000e-01 : f32
    %6 = vector.broadcast %cst_5 : f32 to vector<8x64xf32>
    %7 = arith.mulf %6, %5 : vector<8x64xf32>
    %8 = math.tanh %7 : vector<8x64xf32>
    %c0_6 = arith.constant 0 : index
    %c0_7 = arith.constant 0 : index
    %9 = vector.load %arg4[%c0_6, %c0_7] : memref<64x24xf32, #tpu.memory_space<vmem>>, vector<64x24xf32>
    %cst_8 = arith.constant dense<0.000000e+00> : vector<8x24xf32>
    %10 = tpu.matmul %8, %9, %cst_8 {dimension_numbers = #tpu.dot_dimension_numbers<[1], [0], [0], [1], [0, 0, 1, 1], [], []>} : vector<8x64xf32>, vector<64x24xf32>, vector<8x24xf32> -> vector<8x24xf32>
    %c0_9 = arith.constant 0 : index
    %c0_10 = arith.constant 0 : index
    %11 = vector.load %arg5[%c0_9, %c0_10] : memref<8x24xf32, #tpu.memory_space<vmem>>, vector<8x24xf32>
    tpu.vector_store %arg5[%c0_9, %c0_10], %10 {strides = array<i32>} : memref<8x24xf32, #tpu.memory_space<vmem>>, vector<8x24xf32>,
    return
  }
  func.func @transform_0(%arg0: i32) -> (i32, i32) {
    %c0_i32 = arith.constant 0 : i32
    %c0_i32_0 = arith.constant 0 : i32
    return %arg0, %c0_i32 : i32, i32
  }
  func.func @transform_1(%arg0: i32) -> (i32, i32) {
    %c0_i32 = arith.constant 0 : i32
    %c0_i32_0 = arith.constant 0 : i32
    %c0_i32_1 = arith.constant 0 : i32
    return %c0_i32, %c0_i32_0 : i32, i32
  }
  func.func @transform_2(%arg0: i32) -> (i32, i32) {
    %c0_i32 = arith.constant 0 : i32
    %c0_i32_0 = arith.constant 0 : i32
    %c0_i32_1 = arith.constant 0 : i32
    return %c0_i32, %c0_i32_0 : i32, i32
  }
  func.func @transform_3(%arg0: i32) -> (i32, i32) {
    %c0_i32 = arith.constant 0 : i32
    %c0_i32_0 = arith.constant 0 : i32
    %c0_i32_1 = arith.constant 0 : i32
    return %c0_i32, %c0_i32_0 : i32, i32
  }
  func.func @transform_4(%arg0: i32) -> (i32, i32) {
    %c0_i32 = arith.constant 0 : i32
    %c0_i32_0 = arith.constant 0 : i32
    return %arg0, %c0_i32 : i32, i32
  }
}

</mosaic_0001>

<bundles_post_ra>
// kernel: tpu_custom_call.1
= control target key start
LH: loop header
LB: loop body
LE: loop exit
PB: predicated region body
PF: predicated region fallthrough
CT: control target
= control target key end

     0   :  { %s206_s0 = inlined_call_operand.vmem [shape: f32[8,32], index: 0, kind: input, shape index: {}]   ;;  %s207_s1 = inlined_call_operand.vmem [shape: f32[32,64], index: 1, kind: input, shape index: {}]   ;;  %s208_s2 = inlined_call_operand.vmem [shape: f32[1,64], index: 2, kind: input, shape index: {}]   ;;  %s209_s3 = inlined_call_operand.vmem [shape: f32[64,24], index: 3, kind: input, shape index: {}]   ;;  %s210_s4 = inlined_call_operand.hbm [shape: f32[8,24], index: 4, kind: output, shape index: {}]  }
   0x1   :  { %v22_v0 = vld [vmem:[%s207_s1 + $0x18] sm:$0xff]  ;;  %v21_v1 = vld [vmem:[%s207_s1 + $0x10] sm:$0xff]  ;;  %v20_v3 = vld [vmem:[%s207_s1 + $0x8] sm:$0xff] }
   0x2   :  { %43 = vmatpush.msra.mxu0 %v22_v0  ;;  %v60_v2 = vld [vmem:[%s209_s3 + $0x38] sm:$0xff]  ;;  %v59_v4 = vld [vmem:[%s209_s3 + $0x30] sm:$0xff] }
   0x3   :  { %73 = vmatpush.msra.mxu1 %v60_v2 }
   0x4   :  { %44 = vmatpush.msra.mxu0 %v21_v1 }
   0x5   :  { %9 = vsyncpa [#allocation3], 0  ;;  %v19_v5 = vld [vmem:[%s207_s1] sm:$0xff]  ;;  %74 = vmatpush.msra.mxu1 %v59_v4  ;;  %vm27_vm0 = vcmask 261120   ;;  %v58_v7 = vld [vmem:[%s209_s3 + $0x28] sm:$0xff]  ;;  %vm61_vm1 = vcmask 523264  }
   0x6   :  { %45 = vmatpush.msra.mxu0 %v20_v3  ;;  %v18_v6 = vld [vmem:[%s206_s0] sm:$0xff]  ;;  %v56_v9 = vld [vmem:[%s209_s3 + $0x18] sm:$0xff]  ;;  %v55_v10 = vld [vmem:[%s209_s3 + $0x10] sm:$0xff]  ;;  %s135_s15 = smov [#allocation2]   ;;  %s94_s19 = sshll.u32 %s210_s4, 4  ;;  %vm85_vm2 = vcmask 195584   ;;  %s95_s19 = int_to_ptr.hbm [resolvable:$true] %s94_s19 }
   0x7   :  { %75 = vmatpush.msra.mxu1 %v58_v7  ;;  %v57_v8 = vld [vmem:[%s209_s3 + $0x20] sm:$0xff]  ;;  %v54_v11 = vld [vmem:[%s209_s3 + $0x8] sm:$0xff]  ;;  %s92_s16 = sshll.u32 %s135_s15, 4  ;;  %s93_s16 = int_to_ptr.vmem [resolvable:$true] %s92_s16 }
   0x8   :  { %46 = vmatpush.msra.mxu0 %v19_v5  ;;  %v53_v12 = vld [vmem:[%s209_s3] sm:$0xff] }
   0x9   :  { %103 = vmatmul.msk.f32.vlgmr.msra.gmra.mxu0 %vm27_vm0, %v18_v6  ;;  %76 = vmatpush.msra.mxu1 %v57_v8  ;;  %v106_v13 = vld [vmem:[%s208_s2] ss:$0 sm:$0xff] }
   0xb   :  { %77 = vmatpush.msra.mxu1 %v56_v9 }
   0xd   :  { %78 = vmatpush.msra.mxu1 %v55_v10 }
   0xf   :  { %79 = vmatpush.msra.mxu1 %v54_v11 }
  0x11   :  { %80 = vmatpush.msra.mxu1 %v53_v12 }
  0x86   :  { %v48_v14 = vpop.f32.mrf.mxu0 }
  0x87   :  { %v49_v15 = vadd.f32 %v106_v13, %v48_v14 }
  0x89   :  { %v51_v16 = vmul.f32 0.5, %v49_v15 }
  0x8b   :  { %107 = vtanh.f32 %v51_v16 }
  0x91   :  { %v108_v17 = vpop.eup %107 }
  0x92   :  { %104 = vmatmul.msk.f32.vlgmr.msra.gmra.mxu1 %vm61_vm1, %v108_v17 }
 0x10f   :  { %v82_v18 = vpop.f32.mrf.mxu1 }
 0x110   :  { %86 = vst.msk [vmem:[#allocation2] sm:$0xff] %vm85_vm2, %v82_v18 }
 0x111   :  { %97 = dma.vmem_to_hbm [thread:$0]  %s93_s16, 128, %s95_s19, [#allocation3]  }
 0x112   :  { %133 = dma.done.wait [#allocation3], 128  }
 0x113   :  { %134 = vsyncadd [#allocation3], 4294967168 }
 0x114   :  { %102 = vsyncpa [#allocation3], 1 }

</bundles_post_ra>
